<compile_context>
chip_gen: v7x
topology: tpu7x:2x2x1
jax: 0.10.0
libtpu: 0.0.40
codegen_flags: <defaults>
</compile_context>

<pallas_src>
import jax
import jax.numpy as jnp
from jax.experimental import pallas as pl
from jax.experimental.pallas import tpu as pltpu


def _round_up(n, m):
    return ((n + m - 1) // m) * m


def _disc_kernel(x_ref, w1_ref, b1_ref, w2_ref, b2_ref, wh_ref, bh_ref, out_ref):
    # Layer 1: Linear + LeakyReLU(0.2)   (bf16 operands, f32 accumulate)
    x = x_ref[...].astype(jnp.bfloat16)
    h = jnp.dot(x, w1_ref[...], preferred_element_type=jnp.float32) + b1_ref[...]
    h = jnp.maximum(h, 0.2 * h).astype(jnp.bfloat16)

    # Layer 2: Linear + LeakyReLU(0.2)
    h = jnp.dot(h, w2_ref[...], preferred_element_type=jnp.float32) + b2_ref[...]
    h = jnp.maximum(h, 0.2 * h).astype(jnp.bfloat16)

    # Fused heads: one 128-lane matmul (col 0 = adv logit, cols 1..C = aux
    # logits, padded cols have zero weights and a -1e30 bias).
    logits = jnp.dot(h, wh_ref[...], preferred_element_type=jnp.float32) + bh_ref[...]

    col = jax.lax.broadcasted_iota(jnp.int32, logits.shape, 1)

    # Sigmoid on all lanes (only column 0 is kept). Clamp so exp(-logit) never
    # hits inf before the approximate EUP reciprocal.
    sig = pl.reciprocal(1.0 + jnp.exp(-jnp.maximum(logits, -30.0)), approx=True)

    # Masked softmax over the aux columns (col >= 1). Padded columns already
    # sit at ~-1e30 via the packed bias, so they underflow to zero.
    aux_logits = jnp.where(col >= 1, logits, jnp.float32(-1e30))
    m = jnp.max(aux_logits, axis=1, keepdims=True)
    e = jnp.exp(aux_logits - m)
    denom = jnp.sum(e, axis=1, keepdims=True)
    aux = e * pl.reciprocal(denom, approx=True)

    # Lane-dense bf16 store: col 0 = sigmoid(adv), cols 1..C = softmax(aux).
    out_ref[...] = jnp.where(col == 0, sig, aux).astype(out_ref.dtype)


def prepare_params(params):
    """One-time packing of Discriminator weights for the fused kernel."""
    input_dim, hidden_dim = params["w1"].shape
    num_classes = params["waux"].shape[1]
    head_pad = max(128, _round_up(1 + num_classes, 128))
    pad_cols = head_pad - 1 - num_classes

    # Fused head: [hidden, head_pad], col 0 = adv, cols 1..C = aux, rest zero
    # weights with a -1e30 bias (folds the softmax padding mask into the bias).
    whead = jnp.concatenate(
        [params["wadv"], params["waux"],
         jnp.zeros((hidden_dim, pad_cols), jnp.float32)],
        axis=1).astype(jnp.bfloat16)
    bhead = jnp.concatenate(
        [params["badv"], params["baux"],
         jnp.full((1, pad_cols), -1e30, jnp.float32)],
        axis=1).astype(jnp.float32)

    return {
        "w1": params["w1"].astype(jnp.bfloat16),
        "b1": params["b1"].astype(jnp.float32),
        "w2": params["w2"].astype(jnp.bfloat16),
        "b2": params["b2"].astype(jnp.float32),
        "whead": whead,
        "bhead": bhead,
        "num_classes": num_classes,
    }


def _choose_tb(batch, input_dim, head_pad):
    # >= 2 grid steps when possible (keeps both v7x TensorCores busy with
    # dimension_semantics=("parallel",)), tb a multiple of 8 sublanes, capped
    # at 1024 rows and by a conservative VMEM budget (double-buffered f32 x
    # tile + bf16 out tile + f32 epilogue temporaries) so v5e's smaller scoped
    # VMEM never becomes the limiter even for large input_dim.
    tb = min(1024, max(8, _round_up(-(-batch // 2), 8)))
    bytes_per_row = 2 * input_dim * 4 + 2 * head_pad * 2 + 6 * head_pad * 4
    while tb > 8 and tb * bytes_per_row > (12 << 20):
        tb = max(8, _round_up(tb // 2, 8))
    return tb


def discriminator_forward(x, packed):
    """x: [B, input_dim] float32. packed: output of prepare_params()."""
    B, input_dim = x.shape
    hidden_dim = packed["w1"].shape[1]
    num_classes = packed["num_classes"]
    head_pad = packed["whead"].shape[1]

    tb = _choose_tb(B, input_dim, head_pad)
    grid = (pl.cdiv(B, tb),)
    rows = grid[0] * tb

    flops = 2 * rows * hidden_dim * (input_dim + hidden_dim + head_pad)
    bytes_accessed = (
        B * input_dim * 4
        + (packed["w1"].size + packed["w2"].size + packed["whead"].size) * 2
        + (packed["b1"].size + packed["b2"].size + packed["bhead"].size) * 4
        + B * head_pad * 2)
    transcendentals = 2 * rows * head_pad + 2 * rows

    out = pl.pallas_call(
        _disc_kernel,
        out_shape=jax.ShapeDtypeStruct((B, head_pad), jnp.bfloat16),
        grid=grid,
        in_specs=[
            pl.BlockSpec((tb, input_dim), lambda i: (i, 0)),           # x tile (f32, unpadded)
            pl.BlockSpec((input_dim, hidden_dim), lambda i: (0, 0)),   # w1 (resident)
            pl.BlockSpec((1, hidden_dim), lambda i: (0, 0)),           # b1
            pl.BlockSpec((hidden_dim, hidden_dim), lambda i: (0, 0)),  # w2
            pl.BlockSpec((1, hidden_dim), lambda i: (0, 0)),           # b2
            pl.BlockSpec((hidden_dim, head_pad), lambda i: (0, 0)),    # fused head W
            pl.BlockSpec((1, head_pad), lambda i: (0, 0)),             # fused head b
        ],
        out_specs=pl.BlockSpec((tb, head_pad), lambda i: (i, 0)),
        compiler_params=pltpu.CompilerParams(
            dimension_semantics=("parallel",),
            vmem_limit_bytes=32 << 20),
        cost_estimate=pl.CostEstimate(flops=flops,
                                      transcendentals=transcendentals,
                                      bytes_accessed=bytes_accessed),
    )(x, packed["w1"], packed["b1"], packed["w2"], packed["b2"],
      packed["whead"], packed["bhead"])

    adv = out[:B, 0:1].astype(jnp.float32)
    aux = out[:B, 1:1 + num_classes].astype(jnp.float32)
    return adv, aux


def init_params(key, input_dim, num_classes, hidden_dim=128):
    ks = jax.random.split(key, 8)

    def lin(kw, kb, fan_in, fan_out):
        # Deterministic small-scale init (synthetic weights, not a checkpoint).
        bound = 1.0 / jnp.sqrt(fan_in)
        w = jax.random.uniform(kw, (fan_in, fan_out), jnp.float32, -bound, bound)
        b = jax.random.uniform(kb, (1, fan_out), jnp.float32, -bound, bound)
        return w, b

    w1, b1 = lin(ks[0], ks[1], input_dim, hidden_dim)
    w2, b2 = lin(ks[2], ks[3], hidden_dim, hidden_dim)
    wadv, badv = lin(ks[4], ks[5], hidden_dim, 1)
    waux, baux = lin(ks[6], ks[7], hidden_dim, num_classes)
    return {"w1": w1, "b1": b1, "w2": w2, "b2": b2,
            "wadv": wadv, "badv": badv, "waux": waux, "baux": baux}


def _reference_forward(x, p):
    h = x @ p["w1"] + p["b1"]
    h = jnp.where(h >= 0.0, h, 0.2 * h)
    h = h @ p["w2"] + p["b2"]
    h = jnp.where(h >= 0.0, h, 0.2 * h)
    adv = jax.nn.sigmoid(h @ p["wadv"] + p["badv"])
    aux = jax.nn.softmax(h @ p["waux"] + p["baux"], axis=1)
    return adv, aux


if __name__ == "__main__":
    key = jax.random.PRNGKey(0)
    B, input_dim, num_classes, hidden_dim = 8, 32, 10, 128

    kx, kp, kx2 = jax.random.split(key, 3)
    x = jax.random.normal(kx, (B, input_dim), jnp.float32)
    params = init_params(kp, input_dim, num_classes, hidden_dim)
    packed = prepare_params(params)   # one-time weight packing (hoisted out of fwd)

    adv, aux = discriminator_forward(x, packed)
    jax.block_until_ready((adv, aux))

    assert adv.shape == (B, 1)
    assert aux.shape == (B, num_classes)

    # Compare against a pure-JAX f32 reference (loose tolerance: bf16 matmul
    # operands / bf16 output + approximate EUP reciprocal inside the kernel).
    radv, raux = _reference_forward(x, params)
    assert jnp.allclose(adv, radv, atol=3e-2), "adv mismatch vs reference"
    assert jnp.allclose(aux, raux, atol=3e-2), "aux mismatch vs reference"
    assert jnp.allclose(jnp.sum(aux, axis=1), 1.0, atol=1e-2)

    # Second small case exercising the ragged last batch block (B not a
    # multiple of the batch tile) and the >=2-step grid path.
    B2 = 50
    x2 = jax.random.normal(kx2, (B2, input_dim), jnp.float32)
    adv2, aux2 = discriminator_forward(x2, packed)
    jax.block_until_ready((adv2, aux2))
    radv2, raux2 = _reference_forward(x2, params)
    assert adv2.shape == (B2, 1) and aux2.shape == (B2, num_classes)
    assert jnp.allclose(adv2, radv2, atol=3e-2), "adv mismatch (ragged batch)"
    assert jnp.allclose(aux2, raux2, atol=3e-2), "aux mismatch (ragged batch)"

    print("KERNEL_OK")
</pallas_src>

<mosaic_0001>
module attributes {stable_mosaic.version = 11 : i64} {
  func.func @_disc_kernel(%arg0: i32, %arg1: memref<8x32xf32, #tpu.memory_space<vmem>>, %arg2: memref<32x128xbf16, #tpu.memory_space<vmem>>, %arg3: memref<1x128xf32, #tpu.memory_space<vmem>>, %arg4: memref<128x128xbf16, #tpu.memory_space<vmem>>, %arg5: memref<1x128xf32, #tpu.memory_space<vmem>>, %arg6: memref<128x128xbf16, #tpu.memory_space<vmem>>, %arg7: memref<1x128xf32, #tpu.memory_space<vmem>>, %arg8: memref<8x128xbf16, #tpu.memory_space<vmem>>) attributes {dimension_semantics = [#tpu.dimension_semantics<parallel>], iteration_bounds = array<i64: 1>, scalar_prefetch = 0 : i64, scratch_operands = 0 : i64, tpu.core_type = #tpu.core_type<tc>, window_params = [{transform_indices = @transform_0, window_bounds = array<i64: 8, 32>}, {pipeline_mode = #tpu.pipeline_mode<synchronous>, transform_indices = @transform_1, window_bounds = array<i64: 32, 128>}, {pipeline_mode = #tpu.pipeline_mode<synchronous>, transform_indices = @transform_2, window_bounds = array<i64: 1, 128>}, {pipeline_mode = #tpu.pipeline_mode<synchronous>, transform_indices = @transform_3, window_bounds = array<i64: 128, 128>}, {pipeline_mode = #tpu.pipeline_mode<synchronous>, transform_indices = @transform_4, window_bounds = array<i64: 1, 128>}, {pipeline_mode = #tpu.pipeline_mode<synchronous>, transform_indices = @transform_5, window_bounds = array<i64: 128, 128>}, {pipeline_mode = #tpu.pipeline_mode<synchronous>, transform_indices = @transform_6, window_bounds = array<i64: 1, 128>}, {transform_indices = @transform_7, window_bounds = array<i64: 8, 128>}]} {
    %c0 = arith.constant 0 : index
    %c0_0 = arith.constant 0 : index
    %0 = vector.load %arg1[%c0, %c0_0] : memref<8x32xf32, #tpu.memory_space<vmem>>, vector<8x32xf32>
    %1 = arith.truncf %0 : vector<8x32xf32> to vector<8x32xbf16>
    %c0_1 = arith.constant 0 : index
    %c0_2 = arith.constant 0 : index
    %2 = vector.load %arg2[%c0_1, %c0_2] : memref<32x128xbf16, #tpu.memory_space<vmem>>, vector<32x128xbf16>
    %cst = arith.constant dense<0.000000e+00> : vector<8x128xf32>
    %3 = tpu.matmul %1, %2, %cst {dimension_numbers = #tpu.dot_dimension_numbers<[1], [0], [0], [1], [0, 0, 1, 1], [], []>} : vector<8x32xbf16>, vector<32x128xbf16>, vector<8x128xf32> -> vector<8x128xf32>
    %c0_3 = arith.constant 0 : index
    %c0_4 = arith.constant 0 : index
    %4 = vector.load %arg3[%c0_3, %c0_4] : memref<1x128xf32, #tpu.memory_space<vmem>>, vector<1x128xf32>
    %5 = vector.broadcast %4 : vector<1x128xf32> to vector<8x128xf32>
    %6 = arith.addf %3, %5 : vector<8x128xf32>
    %cst_5 = arith.constant 2.000000e-01 : f32
    %7 = vector.broadcast %cst_5 : f32 to vector<8x128xf32>
    %8 = arith.mulf %7, %6 : vector<8x128xf32>
    %9 = arith.maximumf %6, %8 : vector<8x128xf32>
    %10 = arith.truncf %9 : vector<8x128xf32> to vector<8x128xbf16>
    %c0_6 = arith.constant 0 : index
    %c0_7 = arith.constant 0 : index
    %11 = vector.load %arg4[%c0_6, %c0_7] : memref<128x128xbf16, #tpu.memory_space<vmem>>, vector<128x128xbf16>
    %cst_8 = arith.constant dense<0.000000e+00> : vector<8x128xf32>
    %12 = tpu.matmul %10, %11, %cst_8 {dimension_numbers = #tpu.dot_dimension_numbers<[1], [0], [0], [1], [0, 0, 1, 1], [], []>} : vector<8x128xbf16>, vector<128x128xbf16>, vector<8x128xf32> -> vector<8x128xf32>
    %c0_9 = arith.constant 0 : index
    %c0_10 = arith.constant 0 : index
    %13 = vector.load %arg5[%c0_9, %c0_10] : memref<1x128xf32, #tpu.memory_space<vmem>>, vector<1x128xf32>
    %14 = vector.broadcast %13 : vector<1x128xf32> to vector<8x128xf32>
    %15 = arith.addf %12, %14 : vector<8x128xf32>
    %cst_11 = arith.constant 2.000000e-01 : f32
    %16 = vector.broadcast %cst_11 : f32 to vector<8x128xf32>
    %17 = arith.mulf %16, %15 : vector<8x128xf32>
    %18 = arith.maximumf %15, %17 : vector<8x128xf32>
    %19 = arith.truncf %18 : vector<8x128xf32> to vector<8x128xbf16>
    %c0_12 = arith.constant 0 : index
    %c0_13 = arith.constant 0 : index
    %20 = vector.load %arg6[%c0_12, %c0_13] : memref<128x128xbf16, #tpu.memory_space<vmem>>, vector<128x128xbf16>
    %cst_14 = arith.constant dense<0.000000e+00> : vector<8x128xf32>
    %21 = tpu.matmul %19, %20, %cst_14 {dimension_numbers = #tpu.dot_dimension_numbers<[1], [0], [0], [1], [0, 0, 1, 1], [], []>} : vector<8x128xbf16>, vector<128x128xbf16>, vector<8x128xf32> -> vector<8x128xf32>
    %c0_15 = arith.constant 0 : index
    %c0_16 = arith.constant 0 : index
    %22 = vector.load %arg7[%c0_15, %c0_16] : memref<1x128xf32, #tpu.memory_space<vmem>>, vector<1x128xf32>
    %23 = vector.broadcast %22 : vector<1x128xf32> to vector<8x128xf32>
    %24 = arith.addf %21, %23 : vector<8x128xf32>
    %25 = tpu.iota {dimensions = array<i32: 1>} : vector<8x128xi32>
    %cst_17 = arith.constant -3.000000e+01 : f32
    %26 = vector.broadcast %cst_17 : f32 to vector<8x128xf32>
    %27 = arith.maximumf %24, %26 : vector<8x128xf32>
    %cst_18 = arith.constant 0.000000e+00 : f32
    %28 = vector.broadcast %cst_18 : f32 to vector<8x128xf32>
    %29 = arith.subf %28, %27 : vector<8x128xf32>
    %30 = math.exp %29 : vector<8x128xf32>
    %cst_19 = arith.constant 1.000000e+00 : f32
    %31 = vector.broadcast %cst_19 : f32 to vector<8x128xf32>
    %32 = arith.addf %31, %30 : vector<8x128xf32>
    %33 = tpu.reciprocal %32 {approx = true} : vector<8x128xf32> -> vector<8x128xf32>
    %c1_i32 = arith.constant 1 : i32
    %34 = vector.broadcast %c1_i32 : i32 to vector<8x128xi32>
    %35 = arith.cmpi sge, %25, %34 : vector<8x128xi32>
    %cst_20 = arith.constant -1.000000e+30 : f32
    %36 = vector.broadcast %cst_20 : f32 to vector<8x128xf32>
    %37 = arith.select %35, %24, %36 : vector<8x128xi1>, vector<8x128xf32>
    %cst_21 = arith.constant dense<0xFF800000> : vector<8xf32>
    %38 = vector.multi_reduction <maximumf>, %37, %cst_21 [1] : vector<8x128xf32> to vector<8xf32>
    %39 = vector.shape_cast %38 : vector<8xf32> to vector<8x1xf32>
    %40 = vector.broadcast %39 : vector<8x1xf32> to vector<8x128xf32>
    %41 = arith.subf %37, %40 : vector<8x128xf32>
    %42 = math.exp %41 : vector<8x128xf32>
    %cst_22 = arith.constant dense<0.000000e+00> : vector<8xf32>
    %43 = vector.multi_reduction <add>, %42, %cst_22 [1] : vector<8x128xf32> to vector<8xf32>
    %44 = vector.shape_cast %43 : vector<8xf32> to vector<8x1xf32>
    %45 = tpu.reciprocal %44 {approx = true} : vector<8x1xf32> -> vector<8x1xf32>
    %46 = vector.broadcast %45 : vector<8x1xf32> to vector<8x128xf32>
    %47 = arith.mulf %42, %46 : vector<8x128xf32>
    %c0_i32 = arith.constant 0 : i32
    %48 = vector.broadcast %c0_i32 : i32 to vector<8x128xi32>
    %49 = arith.cmpi eq, %25, %48 : vector<8x128xi32>
    %50 = arith.select %49, %33, %47 : vector<8x128xi1>, vector<8x128xf32>
    %51 = arith.truncf %50 : vector<8x128xf32> to vector<8x128xbf16>
    %c0_23 = arith.constant 0 : index
    %c0_24 = arith.constant 0 : index
    %52 = vector.load %arg8[%c0_23, %c0_24] : memref<8x128xbf16, #tpu.memory_space<vmem>>, vector<8x128xbf16>
    tpu.vector_store %arg8[%c0_23, %c0_24], %51 {strides = array<i32>} : memref<8x128xbf16, #tpu.memory_space<vmem>>, vector<8x128xbf16>,
    return
  }
  func.func @transform_0(%arg0: i32) -> (i32, i32) {
    %c0_i32 = arith.constant 0 : i32
    %c0_i32_0 = arith.constant 0 : i32
    return %arg0, %c0_i32 : i32, i32
  }
  func.func @transform_1(%arg0: i32) -> (i32, i32) {
    %c0_i32 = arith.constant 0 : i32
    %c0_i32_0 = arith.constant 0 : i32
    %c0_i32_1 = arith.constant 0 : i32
    return %c0_i32, %c0_i32_0 : i32, i32
  }
  func.func @transform_2(%arg0: i32) -> (i32, i32) {
    %c0_i32 = arith.constant 0 : i32
    %c0_i32_0 = arith.constant 0 : i32
    %c0_i32_1 = arith.constant 0 : i32
    return %c0_i32, %c0_i32_0 : i32, i32
  }
  func.func @transform_3(%arg0: i32) -> (i32, i32) {
    %c0_i32 = arith.constant 0 : i32
    %c0_i32_0 = arith.constant 0 : i32
    %c0_i32_1 = arith.constant 0 : i32
    return %c0_i32, %c0_i32_0 : i32, i32
  }
  func.func @transform_4(%arg0: i32) -> (i32, i32) {
    %c0_i32 = arith.constant 0 : i32
    %c0_i32_0 = arith.constant 0 : i32
    %c0_i32_1 = arith.constant 0 : i32
    return %c0_i32, %c0_i32_0 : i32, i32
  }
  func.func @transform_5(%arg0: i32) -> (i32, i32) {
    %c0_i32 = arith.constant 0 : i32
    %c0_i32_0 = arith.constant 0 : i32
    %c0_i32_1 = arith.constant 0 : i32
    return %c0_i32, %c0_i32_0 : i32, i32
  }
  func.func @transform_6(%arg0: i32) -> (i32, i32) {
    %c0_i32 = arith.constant 0 : i32
    %c0_i32_0 = arith.constant 0 : i32
    %c0_i32_1 = arith.constant 0 : i32
    return %c0_i32, %c0_i32_0 : i32, i32
  }
  func.func @transform_7(%arg0: i32) -> (i32, i32) {
    %c0_i32 = arith.constant 0 : i32
    %c0_i32_0 = arith.constant 0 : i32
    return %arg0, %c0_i32 : i32, i32
  }
}

</mosaic_0001>

<bundles_post_ra>
// kernel: tpu_custom_call.1
= control target key start
LH: loop header
LB: loop body
LE: loop exit
PB: predicated region body
PF: predicated region fallthrough
CT: control target
= control target key end

     0   :  { %12 = vsyncpa [#allocation3], 0  ;;  %s813_s0 = inlined_call_operand.hbm [shape: f32[8,32], index: 0, kind: input, shape index: {}]   ;;  %s814_s1 = inlined_call_operand.hbm [shape: bf16[32,128], index: 1, kind: input, shape index: {}]   ;;  %s815_s2 = inlined_call_operand.vmem [shape: f32[1,128], index: 2, kind: input, shape index: {}]   ;;  %s816_s3 = inlined_call_operand.hbm [shape: bf16[128,128], index: 3, kind: input, shape index: {}]   ;;  %s817_s4 = inlined_call_operand.vmem [shape: f32[1,128], index: 4, kind: input, shape index: {}]   ;;  %s818_s5 = inlined_call_operand.hbm [shape: bf16[128,128], index: 5, kind: input, shape index: {}]   ;;  %s819_s6 = inlined_call_operand.vmem [shape: f32[1,128], index: 6, kind: input, shape index: {}]   ;;  %s820_s7 = inlined_call_operand.hbm [shape: bf16[8,128], index: 7, kind: output, shape index: {}]  }
   0x1   :  { %13 = vsyncpa [#allocation6], 0 }
   0x2   :  { %14 = vsyncpa [#allocation9], 0 }
   0x3   :  { %15 = vsyncpa [#allocation4], 0  ;;  %s662_s24 = smov [#allocation5]   ;;  %s544_s28 = scalar_lea.hbm %s814_s1, 256 }
   0x4   :  { %s31_s25 = sshll.u32 %s662_s24, 4  ;;  %p545_p0 = scmp.ne.s32.totalorder %s814_s1, %s544_s28  ;;  %s32_s25 = int_to_ptr.vmem [resolvable:$true] %s31_s25 }
   0x5   :  { %p548_p1 = scmp.lt.u32.totalorder %s544_s28, %s814_s1 }
   0x7   :  { %p550_p2 = pnand %p548_p1, %p545_p0 }
   0x9   :  { %553 = shalt.err (!%p550_p2)
}
   0xa   :  { %s554_s10 = scalar_lea.vmem %s32_s25, 256  ;;  %p559_p4 = scmp.lt.s32.totalorder %s32_s25, %s32_s25 }
   0xb   :  { %p555_p3 = scmp.ne.s32.totalorder %s32_s25, %s554_s10  ;;  %p560_p5 = scmp.lt.s32.totalorder %s554_s10, %s554_s10 }
   0xd   :  { %p561_p6 = por %p560_p5, %p559_p4 }
   0xf   :  { %p562_p7 = pnand %p561_p6, %p555_p3 }
  0x11   :  { %565 = shalt.err (!%p562_p7)
}
  0x12   :  { %s663_s11 = smov 64   ;;  %s664_s12 = smov 4  }
  0x13   :  { %37 = dma.hbm_to_vmem [thread:$0]  %s814_s1, 256, %s32_s25, [#allocation6], %s663_s11, %s663_s11, %s664_s12  }
  0x14   :  { %s665_s15 = smov [#allocation2]   ;;  %s666_s17 = smov [#allocation7]  }
  0x15   :  { %s22_s16 = sshll.u32 %s665_s15, 4  ;;  %s45_s18 = sshll.u32 %s666_s17, 4  ;;  %s23_s16 = int_to_ptr.vmem [resolvable:$true] %s22_s16  ;;  %s46_s18 = int_to_ptr.vmem [resolvable:$true] %s45_s18 }
  0x16   :  { %s566_s21 = scalar_lea.hbm %s813_s0, 128 }
  0x17   :  { %p567_p8 = scmp.ne.s32.totalorder %s813_s0, %s566_s21  ;;  %p570_p9 = scmp.lt.u32.totalorder %s566_s21, %s813_s0 }
  0x19   :  { %p572_p10 = pnand %p570_p9, %p567_p8 }
  0x1b   :  { %575 = shalt.err (!%p572_p10)
}
  0x1c   :  { %s576_s1 = scalar_lea.vmem %s23_s16, 128  ;;  %p581_p12 = scmp.lt.s32.totalorder %s23_s16, %s23_s16 }
  0x1d   :  { %p577_p11 = scmp.ne.s32.totalorder %s23_s16, %s576_s1  ;;  %p582_p13 = scmp.lt.s32.totalorder %s576_s1, %s576_s1 }
  0x1f   :  { %p583_p0 = por %p582_p13, %p581_p12 }
  0x21   :  { %p584_p1 = pnand %p583_p0, %p577_p11 }
  0x23   :  { %587 = shalt.err (!%p584_p1)
}
  0x24   :  { %25 = dma.hbm_to_vmem [thread:$0]  %s813_s0, 128, %s23_s16, [#allocation3]  }
  0x25   :  { %s588_s30 = scalar_lea.hbm %s816_s3, 1024 }
  0x26   :  { %p589_p2 = scmp.ne.s32.totalorder %s816_s3, %s588_s30  ;;  %p592_p3 = scmp.lt.u32.totalorder %s588_s30, %s816_s3 }
  0x28   :  { %p594_p4 = pnand %p592_p3, %p589_p2 }
  0x2a   :  { %597 = shalt.err (!%p594_p4)
}
  0x2b   :  { %s598_s14 = scalar_lea.vmem %s46_s18, 1024  ;;  %p603_p6 = scmp.lt.s32.totalorder %s46_s18, %s46_s18 }
  0x2c   :  { %p599_p5 = scmp.ne.s32.totalorder %s46_s18, %s598_s14  ;;  %p604_p7 = scmp.lt.s32.totalorder %s598_s14, %s598_s14 }
  0x2e   :  { %p605_p8 = por %p604_p7, %p603_p6 }
  0x30   :  { %p606_p9 = pnand %p605_p8, %p599_p5 }
  0x32   :  { %609 = shalt.err (!%p606_p9)
}
  0x33   :  { %51 = dma.hbm_to_vmem [thread:$0]  %s816_s3, 1024, %s46_s18, [#allocation6], %s663_s11, %s663_s11, %s664_s12  }
  0x34   :  { %s667_s16 = smov [#allocation8]   ;;  %s610_s21 = scalar_lea.hbm %s818_s5, 1024 }
  0x35   :  { %s59_s17 = sshll.u32 %s667_s16, 4  ;;  %p611_p10 = scmp.ne.s32.totalorder %s818_s5, %s610_s21  ;;  %s60_s17 = int_to_ptr.vmem [resolvable:$true] %s59_s17 }
  0x36   :  { %p614_p11 = scmp.lt.u32.totalorder %s610_s21, %s818_s5 }
  0x38   :  { %p616_p12 = pnand %p614_p11, %p611_p10 }
  0x3a   :  { %619 = shalt.err (!%p616_p12)
}
  0x3b   :  { %s620_s1 = scalar_lea.vmem %s60_s17, 1024  ;;  %p625_p0 = scmp.lt.s32.totalorder %s60_s17, %s60_s17 }
  0x3c   :  { %p621_p13 = scmp.ne.s32.totalorder %s60_s17, %s620_s1  ;;  %p626_p1 = scmp.lt.s32.totalorder %s620_s1, %s620_s1 }
  0x3e   :  { %p627_p2 = por %p626_p1, %p625_p0 }
  0x40   :  { %p628_p3 = pnand %p627_p2, %p621_p13 }
  0x42   :  { %631 = shalt.err (!%p628_p3)
}
  0x43   :  { %65 = dma.hbm_to_vmem [thread:$0]  %s818_s5, 1024, %s60_s17, [#allocation9], %s663_s11, %s663_s11, %s664_s12  }
  0x44   :  { %654 = dma.done.wait [#allocation3], 128  }
  0x45   :  { %655 = vsyncadd [#allocation3], 4294967168 }
  0x46   :  { %656 = dma.done.wait [#allocation6], 1280  }
  0x47   :  { %657 = vsyncadd [#allocation6], 4294966016 }
  0x48   :  { %658 = dma.done.wait [#allocation9], 1024  }
  0x49   :  { %659 = vsyncadd [#allocation9], 4294966272  ;;  %v668_v0 = vmov 0.0   ;;  %vm669_vm0 = vmmov 0   ;;  %v518_v1 = vld [vmem:[#allocation5] sm:$0xff]   ;;  %v519_v2 = vld [vmem:[#allocation5 + $0x8] sm:$0xff]   ;;  %v378_v39 = vlaneseq }
  0x4a   :  { %461 = vmatprep.subr.bf16.mxu0 %v668_v0  ;;  %465 = vmatprep.mubr.msk.bf16.mxu0 %vm669_vm0, %v668_v0  ;;  %v81_v3 = vld [vmem:[#allocation2] sm:$0xff]  ;;  %v520_v4 = vld [vmem:[#allocation7] sm:$0xff]   ;;  %vm106_vm1 = vcmask 261120   ;;  %v522_v7 = vld [vmem:[#allocation7 + $0x10] sm:$0xff]  }
  0x4b   :  { %469 = vmatprep.subr.bf16.mxu1 %v668_v0  ;;  %485 = vmatprep.mubr.msk.bf16.mxu1 %vm669_vm0, %v668_v0  ;;  %v82_v5 = vpack.c.bf16 %v81_v3, %v81_v3  ;;  %v521_v6 = vld [vmem:[#allocation7 + $0x8] sm:$0xff]   ;;  %v523_v8 = vld [vmem:[#allocation7 + $0x18] sm:$0xff]   ;;  %v524_v9 = vld [vmem:[#allocation7 + $0x20] sm:$0xff]   ;;  %v379_v40 = vand.u32 127, %v378_v39 }
  0x4c   :  { %462 = vmatpush3.bf16.msra.mxu0 %v518_v1  ;;  %470 = vmatpush3.bf16.msra.mxu1 %v520_v4  ;;  %v525_v10 = vld [vmem:[#allocation7 + $0x28] sm:$0xff]   ;;  %v526_v11 = vld [vmem:[#allocation7 + $0x30] sm:$0xff]   ;;  %v527_v12 = vld [vmem:[#allocation7 + $0x38] sm:$0xff]  }
  0x4d   :  { %463 = vmatprep.subr.bf16.mxu0 %v668_v0  ;;  %471 = vmatprep.subr.bf16.mxu1 %v668_v0  ;;  %v528_v13 = vld [vmem:[#allocation8] sm:$0xff]   ;;  %v529_v14 = vld [vmem:[#allocation8 + $0x8] sm:$0xff]   ;;  %v530_v15 = vld [vmem:[#allocation8 + $0x10] sm:$0xff]   ;;  %vm386_vm2 = vcmp.ge.s32.totalorder %v379_v40, 1  ;;  %vm397_vm3 = vcmp.eq.s32.totalorder %v379_v40, 0 }
  0x4e   :  { %v531_v16 = vld [vmem:[#allocation8 + $0x18] sm:$0xff]   ;;  %v532_v17 = vld [vmem:[#allocation8 + $0x20] sm:$0xff]   ;;  %v533_v18 = vld [vmem:[#allocation8 + $0x28] sm:$0xff]  }
  0x4f   :  { %v418_v19 = vld [vmem:[%s815_s2] ss:$0 sm:$0xff]  ;;  %v534_v28 = vld [vmem:[#allocation8 + $0x30] sm:$0xff]   ;;  %v535_v29 = vld [vmem:[#allocation8 + $0x38] sm:$0xff]  }
  0x50   :  { %464 = vmatpush3.bf16.msra.mxu0 %v519_v2  ;;  %472 = vmatpush3.bf16.msra.mxu1 %v521_v6  ;;  %v422_v30 = vld [vmem:[%s817_s4] ss:$0 sm:$0xff]  ;;  %s670_s4 = smov [#allocation10]  }
  0x51   :  { %489 = vmatprep.subr.bf16.mxu0 %v668_v0  ;;  %473 = vmatprep.subr.bf16.mxu1 %v668_v0  ;;  %v431_v41 = vld [vmem:[%s819_s6] ss:$0 sm:$0xff]  ;;  %s407_s6 = sshll.u32 %s670_s4, 4  ;;  %s408_s6 = int_to_ptr.vmem [resolvable:$true] %s407_s6 }
  0x52   :  { %s632_s28 = scalar_lea.vmem %s408_s6, 64  ;;  %p637_p5 = scmp.lt.s32.totalorder %s408_s6, %s408_s6 }
  0x53   :  { %466 = vmatmul.mubr.msk.bf16.vlgmr.msra.gmra.mrb[0].mxu0 %vm106_vm1, %v82_v5  ;;  %p633_p4 = scmp.ne.s32.totalorder %s408_s6, %s632_s28  ;;  %p638_p6 = scmp.lt.s32.totalorder %s632_s28, %s632_s28 }
  0x54   :  { %505 = vmatprep.mubr.msk.bf16.mxu0 %vm669_vm0, %v668_v0  ;;  %474 = vmatpush3.bf16.msra.mxu1 %v522_v7 }
  0x55   :  { %475 = vmatprep.subr.bf16.mxu1 %v668_v0  ;;  %490 = vmatpush3.bf16.msra.mxu0 %v528_v13  ;;  %p639_p7 = por %p638_p6, %p637_p5 }
  0x56   :  { %491 = vmatprep.subr.bf16.mxu0 %v668_v0 }
  0x57   :  { %p640_p8 = pnand %p639_p7, %p633_p4 }
  0x58   :  { %476 = vmatpush3.bf16.msra.mxu1 %v523_v8 }
  0x59   :  { %477 = vmatprep.subr.bf16.mxu1 %v668_v0  ;;  %492 = vmatpush3.bf16.msra.mxu0 %v529_v14 }
  0x5a   :  { %493 = vmatprep.subr.bf16.mxu0 %v668_v0 }
  0x5c   :  { %478 = vmatpush3.bf16.msra.mxu1 %v524_v9 }
  0x5d   :  { %479 = vmatprep.subr.bf16.mxu1 %v668_v0  ;;  %494 = vmatpush3.bf16.msra.mxu0 %v530_v15 }
  0x5e   :  { %495 = vmatprep.subr.bf16.mxu0 %v668_v0 }
  0x60   :  { %480 = vmatpush3.bf16.msra.mxu1 %v525_v10 }
  0x61   :  { %481 = vmatprep.subr.bf16.mxu1 %v668_v0  ;;  %496 = vmatpush3.bf16.msra.mxu0 %v531_v16 }
  0x62   :  { %497 = vmatprep.subr.bf16.mxu0 %v668_v0 }
  0x64   :  { %482 = vmatpush3.bf16.msra.mxu1 %v526_v11 }
  0x65   :  { %483 = vmatprep.subr.bf16.mxu1 %v668_v0  ;;  %498 = vmatpush3.bf16.msra.mxu0 %v532_v17 }
  0x66   :  { %499 = vmatprep.subr.bf16.mxu0 %v668_v0 }
  0x68   :  { %484 = vmatpush3.bf16.msra.mxu1 %v527_v12 }
  0x69   :  { %500 = vmatpush3.bf16.msra.mxu0 %v533_v18 }
  0x6a   :  { %501 = vmatprep.subr.bf16.mxu0 %v668_v0 }
  0x6d   :  { %502 = vmatpush3.bf16.msra.mxu0 %v534_v28 }
  0x6e   :  { %503 = vmatprep.subr.bf16.mxu0 %v668_v0 }
  0x71   :  { %504 = vmatpush3.bf16.msra.mxu0 %v535_v29 }
 0x126   :  { %v144_v20 = vpop.f32.mrb[0].mxu0 }
 0x127   :  { %v145_v21 = vadd.f32 %v418_v19, %v144_v20  ;;  %v467_v22 = vpop.f32.mrb[1].mxu0 }
 0x128   :  { %v147_v23 = vpop.f32.mrb[2].mxu0 }
 0x129   :  { %v150_v24 = vmul.f32 0.2, %v145_v21  ;;  %v468_v25 = vpop.f32.mrb[3].mxu0 }
 0x12b   :  { %v151_v26 = vmax.f32 %v145_v21, %v150_v24 }
 0x12d   :  { %v152_v27 = vpack.c.bf16 %v151_v26, %v151_v26 }
 0x12f   :  { %486 = vmatmul.mubr.bf16.vlgmr.msra.gmra.mrb[0].mxu1 %v152_v27 }
 0x202   :  { %v258_v31 = vpop.f32.mrb[0].mxu1 }
 0x203   :  { %v259_v32 = vadd.f32 %v422_v30, %v258_v31  ;;  %v487_v33 = vpop.f32.mrb[1].mxu1 }
 0x204   :  { %v261_v34 = vpop.f32.mrb[2].mxu1 }
 0x205   :  { %v264_v35 = vmul.f32 0.2, %v259_v32  ;;  %v488_v36 = vpop.f32.mrb[3].mxu1 }
 0x207   :  { %v265_v37 = vmax.f32 %v259_v32, %v264_v35 }
 0x209   :  { %v266_v38 = vpack.c.bf16 %v265_v37, %v265_v37 }
 0x20b   :  { %506 = vmatmul.mubr.bf16.vlgmr.msra.gmra.mrb[4].mxu0 %v266_v38 }
 0x2de   :  { %v372_v42 = vpop.f32.mrb[4].mxu0 }
 0x2df   :  { %v373_v43 = vadd.f32 %v431_v41, %v372_v42  ;;  %v507_v44 = vpop.f32.mrb[5].mxu0 }
 0x2e0   :  { %v375_v45 = vpop.f32.mrb[6].mxu0 }
 0x2e1   :  { %v508_v46 = vpop.f32.mrb[7].mxu0  ;;  %v387_v47 = vsel %vm386_vm2, %v373_v43, -1e+30  ;;  %v380_v52 = vmax.f32 %v373_v43, -30.0 }
 0x2e2   :  { %388 = vmax.xlane.f32.xlu0 %v387_v47 }
 0x2e3   :  { %v381_v53 = vsub.f32 0.0, %v380_v52 }
 0x2e5   :  { %v382_v54 = vmul.f32 1.442695, %v381_v53 }
 0x36f   :  { %v389_v48 = vpop.xlane.xlu0 %388 }
 0x370   :  { %v390_v49 = vsub.f32 %v387_v47, %v389_v48 }
 0x372   :  { %v391_v50 = vmul.f32 1.442695, %v390_v49 }
 0x374   :  { %536 = vpow2.f32 %v391_v50 }
 0x375   :  { %538 = vpow2.f32 %v382_v54 }
 0x37e   :  { %v537_v51 = vpop.eup %536 }
 0x37f   :  { %393 = vadd.xlane.f32.xlu0 %v537_v51  ;;  %v539_v55 = vpop.eup %538 }
 0x380   :  { %v384_v56 = vadd.f32 1.0, %v539_v55 }
 0x40c   :  { %v394_v57 = vpop.xlane.xlu0 %393 }
 0x40d   :  { %540 = vrcp.f32 %v394_v57 }
 0x40e   :  { %542 = vrcp.f32 %v384_v56 }
 0x417   :  { %v541_v58 = vpop.eup %540 }
 0x418   :  { %v396_v59 = vmul.f32 %v541_v58, %v537_v51  ;;  %v543_v60 = vpop.eup %542 }
 0x41a   :  { %v398_v61 = vsel %vm397_vm3, %v543_v60, %v396_v59 }
 0x41b   :  { %v399_v62 = vpack.c.bf16 %v398_v61, %v398_v61 }
 0x41d   :  { %400 = vst [vmem:[#allocation10] sm:$0xf] %v399_v62 }
 0x41e   :  { %643 = shalt.err (!%p640_p8)
}
 0x41f   :  { %s644_s8 = scalar_lea.hbm %s820_s7, 64 }
 0x420   :  { %p645_p9 = scmp.ne.s32.totalorder %s820_s7, %s644_s8  ;;  %p648_p10 = scmp.lt.u32.totalorder %s644_s8, %s820_s7 }
 0x422   :  { %p650_p11 = pnand %p648_p10, %p645_p9 }
 0x424   :  { %653 = shalt.err (!%p650_p11)
}
 0x425   :  { %410 = dma.vmem_to_hbm [thread:$0]  %s408_s6, 64, %s820_s7, [#allocation4]  }
 0x426   :  { %660 = dma.done.wait [#allocation4], 64  }
 0x427   :  { %661 = vsyncadd [#allocation4], 4294967232 }
 0x428   :  { %414 = vsyncpa [#allocation3], 1 }
 0x429   :  { %415 = vsyncpa [#allocation6], 1 }
 0x42a   :  { %416 = vsyncpa [#allocation9], 1 }
 0x42b   :  { %417 = vsyncpa [#allocation4], 1 }

</bundles_post_ra>
